<compile_context>
chip_gen: v6e
topology: v6e:2x2x1
jax: 0.10.0
libtpu: 0.0.40
codegen_flags: <defaults>
</compile_context>

<pallas_src>
import jax
import jax.numpy as jnp
from jax.experimental import pallas as pl
from jax.experimental.pallas import tpu as pltpu


def _policy_kernel(x_ref, w1t_ref, b1_ref, w2t_ref, b2_ref, o_ref):
    # x_ref:   [4, TM]   observations, transposed (rows on lanes)
    # w1t_ref: [128, 4]  affine1 weight, [out, in]
    # b1_ref:  [128, 1]
    # w2t_ref: [2, 128]  affine2 weight, [out, in]
    # b2_ref:  [2, 1]
    # o_ref:   [2, TM]   class probabilities, transposed

    # affine1: [128, 4] @ [4, TM] -> [128, TM]   (MXU, f32 accumulate)
    h = jnp.dot(w1t_ref[...], x_ref[...], preferred_element_type=jnp.float32)
    # Dropout (eval mode) == identity; bias + ReLU on the VPU.
    h = jnp.maximum(h + b1_ref[...], 0.0)

    # affine2: [2, 128] @ [128, TM] -> [2, TM]   (MXU)
    s = jnp.dot(w2t_ref[...], h, preferred_element_type=jnp.float32)
    s = s + b2_ref[...]

    # 2-class softmax over the class axis (axis 0 here), rewritten as an
    # elementwise sigmoid of the logit difference: pure VPU/EUP, no
    # cross-lane/sublane reduction, no explicit reciprocal.
    d = s[0:1, :] - s[1:2, :]
    p0 = 1.0 / (1.0 + jnp.exp(-d))      # exp lands on the EUP slot
    p1 = 1.0 - p0
    o_ref[...] = jnp.concatenate([p0, p1], axis=0)


def policy_forward(x, w1, b1, w2, b2, *, tm=1024):
    """x: [B, S, 4] float32.  Returns softmax probabilities [B, S, 2].

    Weights use the [in, out] convention:
      w1: [4, 128], b1: [1, 128], w2: [128, 2], b2: [1, 2]
    """
    B, S, F_in = x.shape
    assert F_in == 4
    M = B * S

    # Row tile: multiple of 128 lanes; shrink for tiny inputs so we don't
    # over-pad.  At tm=1024 the per-step VMEM (x tile + hidden + out tile,
    # double-buffered) is ~1.2 MiB -- well under v7x's 32 MiB scoped default.
    tm = max(128, min(tm, ((M + 127) // 128) * 128))
    m_pad = ((M + tm - 1) // tm) * tm
    grid = (m_pad // tm,)

    # Layout plumbing (cheap, once per call): rows on lanes, classes/features
    # on sublanes, zero-pad rows up to the tile multiple.
    x_t = x.reshape(M, F_in).T                          # [4, M]
    x_t = jnp.pad(x_t, ((0, 0), (0, m_pad - M)))        # [4, m_pad]
    w1t = w1.T                                          # [128, 4]
    b1c = b1.reshape(128, 1)                            # [128, 1]
    w2t = w2.T                                          # [2, 128]
    b2c = b2.reshape(2, 1)                              # [2, 1]

    out_t = pl.pallas_call(
        _policy_kernel,
        out_shape=jax.ShapeDtypeStruct((2, m_pad), jnp.float32),
        grid=grid,
        in_specs=[
            pl.BlockSpec((4, tm), lambda i: (0, i)),     # x tile (pipelined)
            pl.BlockSpec((128, 4), lambda i: (0, 0)),    # weights VMEM-resident
            pl.BlockSpec((128, 1), lambda i: (0, 0)),
            pl.BlockSpec((2, 128), lambda i: (0, 0)),
            pl.BlockSpec((2, 1), lambda i: (0, 0)),
        ],
        out_specs=pl.BlockSpec((2, tm), lambda i: (0, i)),
        compiler_params=pltpu.CompilerParams(
            dimension_semantics=("parallel",)),          # megacore on v7x
    )(x_t, w1t, b1c, w2t, b2c)

    # Un-pad, transpose back to [B, S, 2].
    return out_t[:, :M].T.reshape(B, S, 2)


def init_params(key):
    """Deterministic init mimicking PyTorch Linear default (U[-1/sqrt(fan_in), +])."""
    k1, k2, k3, k4 = jax.random.split(key, 4)
    bound1 = 1.0 / jnp.sqrt(4.0)
    bound2 = 1.0 / jnp.sqrt(128.0)
    w1 = jax.random.uniform(k1, (4, 128), jnp.float32, -bound1, bound1)   # [in, out]
    b1 = jax.random.uniform(k2, (1, 128), jnp.float32, -bound1, bound1)
    w2 = jax.random.uniform(k3, (128, 2), jnp.float32, -bound2, bound2)   # [in, out]
    b2 = jax.random.uniform(k4, (1, 2), jnp.float32, -bound2, bound2)
    return w1, b1, w2, b2


if __name__ == "__main__":
    key = jax.random.PRNGKey(0)
    kx, kp = jax.random.split(key)

    # Small batched observation tensor: [batch=2, steps=8, obs=4]
    x = jax.random.normal(kx, (2, 8, 4), dtype=jnp.float32)
    w1, b1, w2, b2 = init_params(kp)

    probs = policy_forward(x, w1, b1, w2, b2)
    jax.block_until_ready(probs)

    # Reference check in plain JAX (eval-mode dropout == identity).
    h_ref = jnp.maximum(x.reshape(-1, 4) @ w1 + b1, 0.0)
    logits_ref = h_ref @ w2 + b2
    probs_ref = jax.nn.softmax(logits_ref, axis=-1).reshape(2, 8, 2)
    assert jnp.allclose(probs, probs_ref, atol=1e-5, rtol=1e-5)
    assert jnp.allclose(jnp.sum(probs, axis=-1), 1.0, atol=1e-5)

    print("KERNEL_OK")
</pallas_src>

<mosaic_0001>
module attributes {stable_mosaic.version = 11 : i64} {
  func.func @_policy_kernel(%arg0: i32, %arg1: memref<4x128xf32, #tpu.memory_space<vmem>>, %arg2: memref<128x4xf32, #tpu.memory_space<vmem>>, %arg3: memref<128x1xf32, #tpu.memory_space<vmem>>, %arg4: memref<2x128xf32, #tpu.memory_space<vmem>>, %arg5: memref<2x1xf32, #tpu.memory_space<vmem>>, %arg6: memref<2x128xf32, #tpu.memory_space<vmem>>) attributes {dimension_semantics = [#tpu.dimension_semantics<parallel>], iteration_bounds = array<i64: 1>, scalar_prefetch = 0 : i64, scratch_operands = 0 : i64, tpu.core_type = #tpu.core_type<tc>, window_params = [{transform_indices = @transform_0, window_bounds = array<i64: 4, 128>}, {pipeline_mode = #tpu.pipeline_mode<synchronous>, transform_indices = @transform_1, window_bounds = array<i64: 128, 4>}, {pipeline_mode = #tpu.pipeline_mode<synchronous>, transform_indices = @transform_2, window_bounds = array<i64: 128, 1>}, {pipeline_mode = #tpu.pipeline_mode<synchronous>, transform_indices = @transform_3, window_bounds = array<i64: 2, 128>}, {pipeline_mode = #tpu.pipeline_mode<synchronous>, transform_indices = @transform_4, window_bounds = array<i64: 2, 1>}, {transform_indices = @transform_5, window_bounds = array<i64: 2, 128>}]} {
    %c0 = arith.constant 0 : index
    %c0_0 = arith.constant 0 : index
    %0 = vector.load %arg2[%c0, %c0_0] : memref<128x4xf32, #tpu.memory_space<vmem>>, vector<128x4xf32>
    %c0_1 = arith.constant 0 : index
    %c0_2 = arith.constant 0 : index
    %1 = vector.load %arg1[%c0_1, %c0_2] : memref<4x128xf32, #tpu.memory_space<vmem>>, vector<4x128xf32>
    %cst = arith.constant dense<0.000000e+00> : vector<128x128xf32>
    %2 = tpu.matmul %0, %1, %cst {dimension_numbers = #tpu.dot_dimension_numbers<[1], [0], [0], [1], [0, 0, 1, 1], [], []>} : vector<128x4xf32>, vector<4x128xf32>, vector<128x128xf32> -> vector<128x128xf32>
    %c0_3 = arith.constant 0 : index
    %c0_4 = arith.constant 0 : index
    %3 = vector.load %arg3[%c0_3, %c0_4] : memref<128x1xf32, #tpu.memory_space<vmem>>, vector<128x1xf32>
    %4 = vector.broadcast %3 : vector<128x1xf32> to vector<128x128xf32>
    %5 = arith.addf %2, %4 : vector<128x128xf32>
    %cst_5 = arith.constant 0.000000e+00 : f32
    %6 = vector.broadcast %cst_5 : f32 to vector<128x128xf32>
    %7 = arith.maximumf %5, %6 : vector<128x128xf32>
    %c0_6 = arith.constant 0 : index
    %c0_7 = arith.constant 0 : index
    %8 = vector.load %arg4[%c0_6, %c0_7] : memref<2x128xf32, #tpu.memory_space<vmem>>, vector<2x128xf32>
    %cst_8 = arith.constant dense<0.000000e+00> : vector<2x128xf32>
    %9 = tpu.matmul %8, %7, %cst_8 {dimension_numbers = #tpu.dot_dimension_numbers<[1], [0], [0], [1], [0, 0, 1, 1], [], []>} : vector<2x128xf32>, vector<128x128xf32>, vector<2x128xf32> -> vector<2x128xf32>
    %c0_9 = arith.constant 0 : index
    %c0_10 = arith.constant 0 : index
    %10 = vector.load %arg5[%c0_9, %c0_10] : memref<2x1xf32, #tpu.memory_space<vmem>>, vector<2x1xf32>
    %11 = vector.broadcast %10 : vector<2x1xf32> to vector<2x128xf32>
    %12 = arith.addf %9, %11 : vector<2x128xf32>
    %13 = vector.extract_strided_slice %12 {offsets = [0, 0], sizes = [1, 128], strides = [1, 1]} : vector<2x128xf32> to vector<1x128xf32>
    %14 = vector.extract_strided_slice %12 {offsets = [1, 0], sizes = [1, 128], strides = [1, 1]} : vector<2x128xf32> to vector<1x128xf32>
    %15 = arith.subf %13, %14 : vector<1x128xf32>
    %cst_11 = arith.constant 0.000000e+00 : f32
    %16 = vector.broadcast %cst_11 : f32 to vector<1x128xf32>
    %17 = arith.subf %16, %15 : vector<1x128xf32>
    %18 = math.exp %17 : vector<1x128xf32>
    %cst_12 = arith.constant 1.000000e+00 : f32
    %19 = vector.broadcast %cst_12 : f32 to vector<1x128xf32>
    %20 = arith.addf %19, %18 : vector<1x128xf32>
    %cst_13 = arith.constant 1.000000e+00 : f32
    %21 = vector.broadcast %cst_13 : f32 to vector<1x128xf32>
    %22 = arith.divf %21, %20 : vector<1x128xf32>
    %cst_14 = arith.constant 1.000000e+00 : f32
    %23 = vector.broadcast %cst_14 : f32 to vector<1x128xf32>
    %24 = arith.subf %23, %22 : vector<1x128xf32>
    %25 = tpu.concatenate %22, %24 in 0 : vector<1x128xf32>, vector<1x128xf32> -> vector<2x128xf32>
    %c0_15 = arith.constant 0 : index
    %c0_16 = arith.constant 0 : index
    %26 = vector.load %arg6[%c0_15, %c0_16] : memref<2x128xf32, #tpu.memory_space<vmem>>, vector<2x128xf32>
    tpu.vector_store %arg6[%c0_15, %c0_16], %25 {strides = array<i32>} : memref<2x128xf32, #tpu.memory_space<vmem>>, vector<2x128xf32>,
    return
  }
  func.func @transform_0(%arg0: i32) -> (i32, i32) {
    %c0_i32 = arith.constant 0 : i32
    %c0_i32_0 = arith.constant 0 : i32
    return %c0_i32, %arg0 : i32, i32
  }
  func.func @transform_1(%arg0: i32) -> (i32, i32) {
    %c0_i32 = arith.constant 0 : i32
    %c0_i32_0 = arith.constant 0 : i32
    %c0_i32_1 = arith.constant 0 : i32
    return %c0_i32, %c0_i32_0 : i32, i32
  }
  func.func @transform_2(%arg0: i32) -> (i32, i32) {
    %c0_i32 = arith.constant 0 : i32
    %c0_i32_0 = arith.constant 0 : i32
    %c0_i32_1 = arith.constant 0 : i32
    return %c0_i32, %c0_i32_0 : i32, i32
  }
  func.func @transform_3(%arg0: i32) -> (i32, i32) {
    %c0_i32 = arith.constant 0 : i32
    %c0_i32_0 = arith.constant 0 : i32
    %c0_i32_1 = arith.constant 0 : i32
    return %c0_i32, %c0_i32_0 : i32, i32
  }
  func.func @transform_4(%arg0: i32) -> (i32, i32) {
    %c0_i32 = arith.constant 0 : i32
    %c0_i32_0 = arith.constant 0 : i32
    %c0_i32_1 = arith.constant 0 : i32
    return %c0_i32, %c0_i32_0 : i32, i32
  }
  func.func @transform_5(%arg0: i32) -> (i32, i32) {
    %c0_i32 = arith.constant 0 : i32
    %c0_i32_0 = arith.constant 0 : i32
    return %c0_i32, %arg0 : i32, i32
  }
}

</mosaic_0001>

<bundles_post_ra>
// kernel: tpu_custom_call.1
= control target key start
LH: loop header
LB: loop body
LE: loop exit
PB: predicated region body
PF: predicated region fallthrough
CT: control target
= control target key end

     0   :  { %vm183_vm0 = vcmask 1043456   ;;  %vm134_vm1 = vcmask 31744   ;;  %v600_v4 = vmov 0   ;;  %s787_s0 = inlined_call_operand.vmem [shape: f32[4,128], index: 0, kind: input, shape index: {}]   ;;  %s788_s1 = inlined_call_operand.vmem [shape: f32[128,4], index: 1, kind: input, shape index: {}]   ;;  %s789_s2 = inlined_call_operand.vmem [shape: f32[128,1], index: 2, kind: input, shape index: {}]   ;;  %s790_s3 = inlined_call_operand.vmem [shape: f32[2,128], index: 3, kind: input, shape index: {}]   ;;  %s791_s4 = inlined_call_operand.vmem [shape: f32[2,1], index: 4, kind: input, shape index: {}]   ;;  %s792_s5 = inlined_call_operand.hbm [shape: f32[2,128], index: 5, kind: output, shape index: {}]  }
   0x1   :  { %v37_v0 = vld [vmem:[%s787_s0] sm:$0xf]  ;;  %v22_v2 = vld [vmem:[%s788_s1 + $0x8] sm:$0xff]  ;;  %v23_v3 = vld [vmem:[%s788_s1 + $0x10] sm:$0xff]  ;;  %572 = vset.pattern.permute.xlu0 %v600_v4  ;;  %573 = vset.pattern.permute.xlu1 %v600_v4 }
   0x2   :  { %v21_v1 = vld [vmem:[%s788_s1] sm:$0xff]  ;;  %507 = vmatprep.subr.msk.mxu0 %vm183_vm0, %v37_v0  ;;  %v24_v5 = vld [vmem:[%s788_s1 + $0x18] sm:$0xff]  ;;  %v51_v8 = vld [vmem:[%s789_s2 + $0x68] sm:$0xff] }
   0x3   :  { %509 = vmatprep.mubr.msk.f32.mxu0 %vm134_vm1, %v21_v1  ;;  %508 = vmatpush3.msk.msra.mxu0 %vm183_vm0, %v37_v0  ;;  %v25_v6 = vld [vmem:[%s788_s1 + $0x20] sm:$0xff]  ;;  %v53_v7 = vld [vmem:[%s789_s2 + $0x78] sm:$0xff]  ;;  %v52_v9 = vld [vmem:[%s789_s2 + $0x70] sm:$0xff] }
   0x4   :  { %510 = vmatmul.mubr.msk.f32.vlgmr.msra.gmra.mxu0 %vm134_vm1, %v22_v2  ;;  %131 = vperm.xlu0 %572, %v53_v7   ;;  %v26_v10 = vld [vmem:[%s788_s1 + $0x28] sm:$0xff]  ;;  %v50_v11 = vld [vmem:[%s789_s2 + $0x60] sm:$0xff]  ;;  %v27_v12 = vld [vmem:[%s788_s1 + $0x30] sm:$0xff] }
   0x5   :  { %512 = vmatprep.mubr.msk.f32.mxu0 %vm134_vm1, %v23_v3  ;;  %121 = vperm.xlu1 %573, %v51_v8   ;;  %v49_v13 = vld [vmem:[%s789_s2 + $0x58] sm:$0xff] }
   0x8   :  { %513 = vmatmul.mubr.msk.f32.gmra.mxu0 %vm134_vm1, %v24_v5  ;;  %126 = vperm.xlu0 %572, %v52_v9  }
   0x9   :  { %515 = vmatprep.mubr.msk.f32.mxu0 %vm134_vm1, %v25_v6  ;;  %116 = vperm.xlu1 %573, %v50_v11  }
   0xc   :  { %516 = vmatmul.mubr.msk.f32.gmra.mxu0 %vm134_vm1, %v26_v10 }
   0xd   :  { %10 = vsyncpa [#allocation3], 0  ;;  %518 = vmatprep.mubr.msk.f32.mxu0 %vm134_vm1, %v27_v12  ;;  %v28_v14 = vld [vmem:[%s788_s1 + $0x38] sm:$0xff]  ;;  %v48_v15 = vld [vmem:[%s789_s2 + $0x50] sm:$0xff]  ;;  %111 = vperm.xlu0 %572, %v49_v13   ;;  %v601_v35 = vmov 0.0   ;;  %vm602_vm2 = vmmov 0  }
   0xe   :  { %v29_v16 = vld [vmem:[%s788_s1 + $0x40] sm:$0xff]  ;;  %106 = vperm.xlu1 %573, %v48_v15   ;;  %v47_v17 = vld [vmem:[%s789_s2 + $0x48] sm:$0xff]  ;;  %v31_v20 = vld [vmem:[%s788_s1 + $0x50] sm:$0xff]  ;;  %533 = vmatprep.subr.mxu1 %v601_v35  ;;  %s603_s7 = smov [#allocation2]   ;;  %vm439_vm3 = vcmask 1040384  }
   0xf   :  { %v30_v18 = vld [vmem:[%s788_s1 + $0x48] sm:$0xff]  ;;  %v46_v19 = vld [vmem:[%s789_s2 + $0x40] sm:$0xff]  ;;  %v45_v21 = vld [vmem:[%s789_s2 + $0x38] sm:$0xff]  ;;  %565 = vmatprep.mubr.msk.f32.mxu1 %vm602_vm2, %v601_v35 }
  0x10   :  { %519 = vmatmul.mubr.msk.f32.gmra.mxu0 %vm134_vm1, %v28_v14  ;;  %v32_v22 = vld [vmem:[%s788_s1 + $0x58] sm:$0xff]  ;;  %v44_v23 = vld [vmem:[%s789_s2 + $0x30] sm:$0xff]  ;;  %v33_v24 = vld [vmem:[%s788_s1 + $0x60] sm:$0xff] }
  0x11   :  { %521 = vmatprep.mubr.msk.f32.mxu0 %vm134_vm1, %v29_v16  ;;  %101 = vperm.xlu0 %572, %v47_v17   ;;  %v43_v25 = vld [vmem:[%s789_s2 + $0x28] sm:$0xff]  ;;  %v42_v27 = vld [vmem:[%s789_s2 + $0x20] sm:$0xff]  ;;  %v35_v28 = vld [vmem:[%s788_s1 + $0x70] sm:$0xff] }
  0x12   :  { %96 = vperm.xlu1 %573, %v46_v19   ;;  %v34_v26 = vld [vmem:[%s788_s1 + $0x68] sm:$0xff]  ;;  %v41_v29 = vld [vmem:[%s789_s2 + $0x18] sm:$0xff]  ;;  %v40_v31 = vld [vmem:[%s789_s2 + $0x10] sm:$0xff] }
  0x13   :  { %v36_v30 = vld [vmem:[%s788_s1 + $0x78] sm:$0xff]  ;;  %v39_v32 = vld [vmem:[%s789_s2 + $0x8] sm:$0xff]  ;;  %v38_v33 = vld [vmem:[%s789_s2] sm:$0xff] }
  0x14   :  { %522 = vmatmul.mubr.msk.f32.gmra.mxu0 %vm134_vm1, %v30_v18  ;;  %v349_v34 = vld [vmem:[%s791_s4] sm:$0x3] }
  0x15   :  { %524 = vmatprep.mubr.msk.f32.mxu0 %vm134_vm1, %v31_v20  ;;  %91 = vperm.xlu0 %572, %v45_v21  }
  0x16   :  { %86 = vperm.xlu1 %573, %v44_v23  }
  0x18   :  { %525 = vmatmul.mubr.msk.f32.gmra.mxu0 %vm134_vm1, %v32_v22 }
  0x19   :  { %527 = vmatprep.mubr.msk.f32.mxu0 %vm134_vm1, %v33_v24  ;;  %81 = vperm.xlu0 %572, %v43_v25  }
  0x1a   :  { %76 = vperm.xlu1 %573, %v42_v27  }
  0x1c   :  { %528 = vmatmul.mubr.msk.f32.gmra.mxu0 %vm134_vm1, %v34_v26 }
  0x1d   :  { %530 = vmatprep.mubr.msk.f32.mxu0 %vm134_vm1, %v35_v28  ;;  %71 = vperm.xlu0 %572, %v41_v29  }
  0x1e   :  { %66 = vperm.xlu1 %573, %v40_v31  }
  0x20   :  { %531 = vmatmul.mubr.msk.f32.gmra.mxu0 %vm134_vm1, %v36_v30 }
  0x21   :  { %61 = vperm.xlu0 %572, %v39_v32  }
  0x22   :  { %56 = vperm.xlu1 %573, %v38_v33  }
  0x25   :  { %352 = vperm.xlu0 %572, %v349_v34  }
  0x7f   :  { %v132_v41 = vpop.permute.xlu0 %131 }
  0x80   :  { %v122_v43 = vpop.permute.xlu1 %121 }
  0x83   :  { %v127_v46 = vpop.permute.xlu0 %126 }
  0x84   :  { %v117_v48 = vpop.permute.xlu1 %116 }
  0x88   :  { %v112_v51 = vpop.permute.xlu0 %111 }
  0x89   :  { %v107_v53 = vpop.permute.xlu1 %106 }
  0x8c   :  { %v102_v56 = vpop.permute.xlu0 %101 }
  0x8d   :  { %v97_v59 = vpop.permute.xlu1 %96 }
  0x90   :  { %v92_v2 = vpop.permute.xlu0 %91 }
  0x91   :  { %v87_v5 = vpop.permute.xlu1 %86 }
  0x94   :  { %v82_v10 = vpop.permute.xlu0 %81 }
  0x95   :  { %v77_v13 = vpop.permute.xlu1 %76 }
  0x98   :  { %v72_v18 = vpop.permute.xlu0 %71 }
  0x99   :  { %v67_v21 = vpop.permute.xlu1 %66 }
  0x9c   :  { %v62_v26 = vpop.permute.xlu0 %61 }
  0x9d   :  { %v57_v29 = vpop.permute.xlu1 %56 }
  0xc4   :  { %v754_v36 = vpop.f32.mrf.mxu0 }
  0xc5   :  { %v259_v30 = vadd.f32 %v754_v36, %v62_v26  ;;  %v348_v36 = vld [vmem:[%s790_s3] sm:$0x3]  ;;  %s448_s3 = sshll.u32 %s603_s7, 4  ;;  %s449_s3 = int_to_ptr.vmem [resolvable:$true] %s448_s3 }
  0xc6   :  { %v756_v37 = vpop.f32.mrf.mxu0  ;;  %s578_s8 = scalar_lea.vmem %s449_s3, 32  ;;  %p583_p1 = scmp.lt.s32.totalorder %s449_s3, %s449_s3 }
  0xc7   :  { %v254_v32 = vadd.f32 %v756_v37, %v57_v29  ;;  %v333_v34 = vmax.f32 %v259_v30, 0.0  ;;  %p579_p0 = scmp.ne.s32.totalorder %s449_s3, %s578_s8  ;;  %p584_p2 = scmp.lt.s32.totalorder %s578_s8, %s578_s8 }
  0xc8   :  { %v758_v38 = vpop.f32.mrf.mxu0 }
  0xc9   :  { %v269_v24 = vadd.f32 %v758_v38, %v72_v18  ;;  %v332_v38 = vmax.f32 %v254_v32, 0.0  ;;  %p585_p3 = por %p584_p2, %p583_p1 }
  0xca   :  { %v760_v39 = vpop.f32.mrf.mxu0 }
  0xcb   :  { %v264_v27 = vadd.f32 %v760_v39, %v67_v21  ;;  %v335_v31 = vmax.f32 %v269_v24, 0.0  ;;  %v353_v39 = vpop.permute.xlu0 %352  ;;  %p586_p4 = pnand %p585_p3, %p579_p0 }
  0xcc   :  { %v517_v40 = vpop.f32.mrf.mxu0 }
  0xcd   :  { %v279_v19 = vadd.f32 %v517_v40, %v82_v10  ;;  %v334_v33 = vmax.f32 %v264_v27, 0.0 }
  0xce   :  { %v273_v42 = vpop.f32.mrf.mxu0 }
  0xcf   :  { %v274_v22 = vadd.f32 %v273_v42, %v77_v13  ;;  %v337_v25 = vmax.f32 %v279_v19, 0.0 }
  0xd0   :  { %v520_v44 = vpop.f32.mrf.mxu0 }
  0xd1   :  { %v289_v14 = vadd.f32 %v520_v44, %v92_v2  ;;  %v336_v28 = vmax.f32 %v274_v22, 0.0 }
  0xd2   :  { %v283_v45 = vpop.f32.mrf.mxu0 }
  0xd3   :  { %v284_v16 = vadd.f32 %v283_v45, %v87_v5  ;;  %v339_v20 = vmax.f32 %v289_v14, 0.0 }
  0xd4   :  { %v523_v47 = vpop.f32.mrf.mxu0 }
  0xd5   :  { %v299_v8 = vadd.f32 %v523_v47, %v102_v56  ;;  %v338_v23 = vmax.f32 %v284_v16, 0.0 }
  0xd6   :  { %v293_v49 = vpop.f32.mrf.mxu0 }
  0xd7   :  { %v294_v11 = vadd.f32 %v293_v49, %v97_v59  ;;  %v341_v15 = vmax.f32 %v299_v8, 0.0 }
  0xd8   :  { %v526_v50 = vpop.f32.mrf.mxu0 }
  0xd9   :  { %v309_v3 = vadd.f32 %v526_v50, %v112_v51  ;;  %v340_v17 = vmax.f32 %v294_v11, 0.0 }
  0xda   :  { %v303_v52 = vpop.f32.mrf.mxu0 }
  0xdb   :  { %v304_v6 = vadd.f32 %v303_v52, %v107_v53  ;;  %v343_v9 = vmax.f32 %v309_v3, 0.0 }
  0xdc   :  { %v529_v54 = vpop.f32.mrf.mxu0 }
  0xdd   :  { %v319_v61 = vadd.f32 %v529_v54, %v122_v43  ;;  %v342_v12 = vmax.f32 %v304_v6, 0.0 }
  0xde   :  { %v313_v55 = vpop.f32.mrf.mxu0 }
  0xdf   :  { %v314_v0 = vadd.f32 %v313_v55, %v117_v48  ;;  %v345_v4 = vmax.f32 %v319_v61, 0.0 }
  0xe0   :  { %v532_v57 = vpop.f32.mrf.mxu0 }
  0xe1   :  { %v329_v58 = vadd.f32 %v532_v57, %v132_v41  ;;  %v344_v7 = vmax.f32 %v314_v0, 0.0 }
  0xe2   :  { %v323_v60 = vpop.f32.mrf.mxu0 }
  0xe3   :  { %v347_v62 = vmax.f32 %v329_v58, 0.0  ;;  %v324_v63 = vadd.f32 %v323_v60, %v127_v46 }
  0xe5   :  { %v346_v1 = vmax.f32 %v324_v63, 0.0  ;;  %534 = vmatpush3.msra.mxu1 %v347_v62 }
  0xe6   :  { %535 = vmatprep.subr.mxu1 %v601_v35 }
  0xe7   :  { %536 = vmatpush3.msra.mxu1 %v346_v1 }
  0xe8   :  { %537 = vmatprep.subr.mxu1 %v601_v35 }
  0xe9   :  { %538 = vmatpush3.msra.mxu1 %v345_v4 }
  0xea   :  { %539 = vmatprep.subr.mxu1 %v601_v35 }
  0xeb   :  { %540 = vmatpush3.msra.mxu1 %v344_v7 }
  0xec   :  { %541 = vmatprep.subr.mxu1 %v601_v35 }
  0xed   :  { %542 = vmatpush3.msra.mxu1 %v343_v9 }
  0xee   :  { %543 = vmatprep.subr.mxu1 %v601_v35 }
  0xef   :  { %544 = vmatpush3.msra.mxu1 %v342_v12 }
  0xf0   :  { %545 = vmatprep.subr.mxu1 %v601_v35 }
  0xf1   :  { %546 = vmatpush3.msra.mxu1 %v341_v15 }
  0xf2   :  { %547 = vmatprep.subr.mxu1 %v601_v35 }
  0xf3   :  { %548 = vmatpush3.msra.mxu1 %v340_v17 }
  0xf4   :  { %549 = vmatprep.subr.mxu1 %v601_v35 }
  0xf5   :  { %550 = vmatpush3.msra.mxu1 %v339_v20 }
  0xf6   :  { %551 = vmatprep.subr.mxu1 %v601_v35 }
  0xf7   :  { %552 = vmatpush3.msra.mxu1 %v338_v23 }
  0xf8   :  { %553 = vmatprep.subr.mxu1 %v601_v35 }
  0xf9   :  { %554 = vmatpush3.msra.mxu1 %v337_v25 }
  0xfa   :  { %555 = vmatprep.subr.mxu1 %v601_v35 }
  0xfb   :  { %556 = vmatpush3.msra.mxu1 %v336_v28 }
  0xfc   :  { %557 = vmatprep.subr.mxu1 %v601_v35 }
  0xfd   :  { %558 = vmatpush3.msra.mxu1 %v335_v31 }
  0xfe   :  { %559 = vmatprep.subr.mxu1 %v601_v35 }
  0xff   :  { %560 = vmatpush3.msra.mxu1 %v334_v33 }
 0x100   :  { %561 = vmatprep.subr.mxu1 %v601_v35 }
 0x101   :  { %562 = vmatpush3.msra.mxu1 %v333_v34 }
 0x102   :  { %563 = vmatprep.subr.mxu1 %v601_v35 }
 0x103   :  { %564 = vmatpush3.msra.mxu1 %v332_v38 }
 0x104   :  { %566 = vmatmul.mubr.f32.vlgmr.msra.gmra.mxu1 %v348_v36 }
 0x1c4   :  { %v421_v37 = vpop.f32.mrf.mxu1 }
 0x1c5   :  { %v422_v40 = vadd.f32 %v421_v37, %v353_v39 }
 0x1c6   :  { %v567_v41 = vpop.f32.mrf.mxu1 }
 0x1c7   :  { %v426_v42 = vrot.slane %v422_v40, 1 }
 0x1c9   :  { %v428_v43 = vsub.f32 %v422_v40, %v426_v42 }
 0x1cb   :  { %v429_v44 = vsub.f32 0.0, %v428_v43 }
 0x1cd   :  { %v430_v45 = vmul.f32 1.442695, %v429_v44 }
 0x1cf   :  { %574 = vpow2.f32 %v430_v45 }
 0x1dc   :  { %v575_v46 = vpop.eup %574 }
 0x1dd   :  { %v432_v47 = vadd.f32 1.0, %v575_v46 }
 0x1df   :  { %576 = vrcp.f32 %v432_v47 }
 0x1ec   :  { %v577_v48 = vpop.eup %576 }
 0x1ed   :  { %v435_v49 = vsub.f32 1.0, %v577_v48 }
 0x1ef   :  { %v437_v35 = vrot.slane %v435_v49, 7 }
 0x1f1   :  { %v440_v50 = vsel %vm439_vm3, %v577_v48, %v437_v35 }
 0x1f2   :  { %441 = vst [vmem:[#allocation2] sm:$0x3] %v440_v50 }
 0x1f3   :  { %589 = shalt.err (!%p586_p4)
}
 0x1f4   :  { %451 = dma.vmem_to_hbm [thread:$0]  %s449_s3, 32, %s792_s5, [#allocation3]  }
 0x1f5   :  { %598 = dma.done.wait [#allocation3], 32  }
 0x1f6   :  { %599 = vsyncadd [#allocation3], 4294967264 }
 0x1f7   :  { %455 = vsyncpa [#allocation3], 1 }

</bundles_post_ra>
